<compile_context>
chip_gen: v5e
topology: v5e:2x2
jax: 0.10.0
libtpu: 0.0.40
codegen_flags: <defaults>
</compile_context>

<pallas_src>
import functools

import jax
import jax.numpy as jnp
from jax.experimental import pallas as pl
from jax.experimental.pallas import tpu as pltpu


# ----------------------------------------------------------------------------
# Kernels
# ----------------------------------------------------------------------------
def _act(h, neg_slope):
    # neg_slope is a static Python float: 0.0 -> relu, 0.01 -> leaky_relu.
    if neg_slope:
        return jnp.where(h > 0, h, neg_slope * h)
    return jnp.maximum(h, 0.0)


def _resident_kernel(x_ref, w1_ref, w2_ref, b1_ref, b2_ref, o_ref, *,
                     neg_slope, residual):
    """Both (Hp, Hp) BN-folded weights stay VMEM-resident; batch is tiled."""
    x = x_ref[...]                                        # residual kept in f32
    h = jnp.dot(x.astype(w1_ref.dtype), w1_ref[...],
                preferred_element_type=jnp.float32)
    h = _act(h + b1_ref[...], neg_slope)
    h = jnp.dot(h.astype(w2_ref.dtype), w2_ref[...],
                preferred_element_type=jnp.float32)
    h = _act(h + b2_ref[...], neg_slope)
    if residual:
        h = h + x.astype(jnp.float32)
    o_ref[...] = h.astype(o_ref.dtype)


def _ktiled_kernel(x_ref, w1_ref, w2_ref, b1_ref, b2_ref, o_ref, acc_ref, *,
                   neg_slope, residual):
    """Fallback when resident weights don't fit VMEM (v7x / large Hp).

    Grid = (batch tiles, Hp // TK).  Per k-slab: compute the k-th column slab
    of h = act(x @ w1 + b1) and accumulate its contribution h_k @ w2[k] into
    an f32 scratch; finalize (shift, act, residual, store) on the last slab.
    """
    k = pl.program_id(1)

    @pl.when(k == 0)
    def _():
        acc_ref[...] = jnp.zeros_like(acc_ref)

    x = x_ref[...]
    h = jnp.dot(x.astype(w1_ref.dtype), w1_ref[...],
                preferred_element_type=jnp.float32)        # (TM, TK)
    h = _act(h + b1_ref[...], neg_slope)
    acc_ref[...] += jnp.dot(h.astype(w2_ref.dtype), w2_ref[...],
                            preferred_element_type=jnp.float32)

    @pl.when(k == pl.num_programs(1) - 1)
    def _():
        out = _act(acc_ref[...] + b2_ref[...], neg_slope)
        if residual:
            out = out + x.astype(jnp.float32)
        o_ref[...] = out.astype(o_ref.dtype)


# ----------------------------------------------------------------------------
# Wrapper helpers
# ----------------------------------------------------------------------------
def _round_up(x, m):
    return pl.cdiv(x, m) * m


def _physical_vmem_bytes():
    try:
        return int(pltpu.get_tpu_info().vmem_capacity_bytes)
    except Exception:
        pass
    try:
        kind = jax.devices()[0].device_kind.lower()
    except Exception:
        kind = ""
    if "v2" in kind or "v3" in kind:
        return 16 * 1024 * 1024
    if "v7" in kind:
        return 64 * 1024 * 1024
    return 128 * 1024 * 1024       # v4 / v5e / v5p / v6e


def prepare_residual_block_params(w1, w2, bn1, bn2, eps=1e-5, use_bf16=True):
    """One-time prep: fold eval-mode BN into the linears, transpose to (in,out),
    zero-pad the hidden dim to a lane-dense multiple of 128 and cast to the MXU
    dtype.  Hoisted out of the per-call hot path."""
    H = w1.shape[0]
    Hp = _round_up(max(H, 128), 128)

    def fold(bn):
        inv_std = jax.lax.rsqrt(bn["running_var"].astype(jnp.float32) + eps)
        scale = bn["gamma"].astype(jnp.float32) * inv_std
        shift = (bn["beta"].astype(jnp.float32)
                 - bn["running_mean"].astype(jnp.float32) * scale)
        return scale, shift

    s1, b1 = fold(bn1)
    s2, b2 = fold(bn2)
    w_dtype = jnp.bfloat16 if use_bf16 else jnp.float32

    def prep_w(w, s):
        wf = w.astype(jnp.float32).T * s[None, :]          # (in, out), BN scale folded
        if Hp != H:
            wf = jnp.pad(wf, ((0, Hp - H), (0, Hp - H)))
        return wf.astype(w_dtype)

    def prep_b(b):
        if Hp != H:
            b = jnp.pad(b, (0, Hp - H))
        return b.reshape(1, Hp).astype(jnp.float32)

    return {"w1": prep_w(w1, s1), "w2": prep_w(w2, s2),
            "b1": prep_b(b1), "b2": prep_b(b2), "H": H, "Hp": Hp}


def residual_block_apply(x, params, *, block_m=512, activation="relu",
                         residual=True, out_dtype=None, force_ktiled=False):
    """Apply the fused ResidualBlock forward (eval-mode BN, dropout p=0)."""
    B, H = x.shape
    assert H == params["H"], "hidden size mismatch with prepared params"
    Hp = params["Hp"]
    out_dtype = out_dtype or x.dtype
    neg_slope = {"relu": 0.0, "leaky_relu": 0.01}[activation]

    # --- batch tiling --------------------------------------------------------
    ntiles = pl.cdiv(B, block_m)
    if ntiles == 1 and B >= 16:
        ntiles = 2     # >=2 batch tiles lets the "parallel" axis use both v7x TCs
    TM = _round_up(pl.cdiv(B, ntiles), 8)   # x / out stay f32 -> 8-row alignment

    # --- VMEM budgeting ------------------------------------------------------
    vmem_limit = min(int(_physical_vmem_bytes() * 0.8), 100 * 1024 * 1024)
    budget = int(vmem_limit * 0.75)         # headroom for Mosaic scratch / spills
    w_bytes = jnp.dtype(params["w1"].dtype).itemsize

    variant = "ktiled" if force_ktiled else "resident"
    if variant == "resident":
        while True:
            # single-buffered weights + double-buffered f32 x/out tiles + h headroom
            need = 2 * Hp * Hp * w_bytes + 6 * TM * Hp * 4
            if need <= budget:
                break
            if TM <= 64:
                variant = "ktiled"
                break
            TM = max(64, _round_up(TM // 2, 8))

    TK = None
    if variant == "ktiled":
        while TM > 64 and 5 * TM * Hp * 4 > budget // 2:
            TM = max(64, _round_up(TM // 2, 8))
        TK = 128
        for cand in (1024, 512, 256):
            if Hp % cand == 0 and 4 * Hp * cand * w_bytes + 5 * TM * Hp * 4 <= budget:
                TK = cand
                break
        # TODO(synk): for extreme Hp also N-tile w2 / stream it from pl.ANY HBM.

    Bp = _round_up(B, TM)

    # --- activation padding (skipped when already aligned) -------------------
    aligned = (Bp == B) and (Hp == H)
    x_p = x if aligned else jnp.pad(x, ((0, Bp - B), (0, Hp - H)))
    # TODO(synk): input_output_aliases={0: 0} could reuse x's HBM buffer for the
    # output in the aligned f32 path; skipped to avoid clobbering live callers.

    compiler_params = pltpu.CompilerParams(
        dimension_semantics=("parallel",) if variant == "resident"
        else ("parallel", "arbitrary"),
        vmem_limit_bytes=vmem_limit,
    )

    if variant == "resident":
        kern = functools.partial(_resident_kernel, neg_slope=neg_slope,
                                 residual=residual)
        out_p = pl.pallas_call(
            kern,
            out_shape=jax.ShapeDtypeStruct((Bp, Hp), out_dtype),
            grid=(Bp // TM,),
            in_specs=[
                pl.BlockSpec((TM, Hp), lambda i: (i, 0)),
                pl.BlockSpec((Hp, Hp), lambda i: (0, 0),
                             pipeline_mode=pl.Buffered(1)),
                pl.BlockSpec((Hp, Hp), lambda i: (0, 0),
                             pipeline_mode=pl.Buffered(1)),
                pl.BlockSpec((1, Hp), lambda i: (0, 0),
                             pipeline_mode=pl.Buffered(1)),
                pl.BlockSpec((1, Hp), lambda i: (0, 0),
                             pipeline_mode=pl.Buffered(1)),
            ],
            out_specs=pl.BlockSpec((TM, Hp), lambda i: (i, 0)),
            compiler_params=compiler_params,
        )(x_p, params["w1"], params["w2"], params["b1"], params["b2"])
    else:
        kern = functools.partial(_ktiled_kernel, neg_slope=neg_slope,
                                 residual=residual)
        out_p = pl.pallas_call(
            kern,
            out_shape=jax.ShapeDtypeStruct((Bp, Hp), out_dtype),
            grid=(Bp // TM, Hp // TK),
            in_specs=[
                pl.BlockSpec((TM, Hp), lambda i, k: (i, 0)),
                pl.BlockSpec((Hp, TK), lambda i, k: (0, k)),
                pl.BlockSpec((TK, Hp), lambda i, k: (k, 0)),
                pl.BlockSpec((1, TK), lambda i, k: (0, k)),
                pl.BlockSpec((1, Hp), lambda i, k: (0, 0),
                             pipeline_mode=pl.Buffered(1)),
            ],
            out_specs=pl.BlockSpec((TM, Hp), lambda i, k: (i, 0)),
            scratch_shapes=[pltpu.VMEM((TM, Hp), jnp.float32)],
            compiler_params=compiler_params,
        )(x_p, params["w1"], params["w2"], params["b1"], params["b2"])

    return out_p if aligned else out_p[:B, :H]


def residual_block(x, w1, w2, bn1, bn2, eps=1e-5, use_bf16=True, **kwargs):
    """One-shot convenience wrapper (prep + apply). For repeated inference,
    call prepare_residual_block_params once and residual_block_apply per step."""
    params = prepare_residual_block_params(w1, w2, bn1, bn2, eps=eps,
                                           use_bf16=use_bf16)
    return residual_block_apply(x, params, **kwargs)


# ----------------------------------------------------------------------------
# Pure-JAX reference (eval-mode BN, dropout p=0, relu, residual=True)
# ----------------------------------------------------------------------------
def reference(x, w1, w2, bn1, bn2, eps=1e-5):
    def bn_apply(h, bn):
        return ((h - bn["running_mean"]) / jnp.sqrt(bn["running_var"] + eps)
                * bn["gamma"] + bn["beta"])

    res = x
    h = jnp.maximum(bn_apply(x @ w1.T, bn1), 0.0)
    h = jnp.maximum(bn_apply(h @ w2.T, bn2), 0.0)
    return h + res


if __name__ == "__main__":
    key = jax.random.PRNGKey(0)
    B, H = 8, 32  # batch, hidden_size

    keys = jax.random.split(key, 9)
    x = jax.random.normal(keys[0], (B, H), dtype=jnp.float32)
    # nn.Linear weights: (out_features, in_features), bias=False
    w1 = jax.random.normal(keys[1], (H, H), dtype=jnp.float32) * 0.1
    w2 = jax.random.normal(keys[2], (H, H), dtype=jnp.float32) * 0.1
    # BatchNorm1d eval-mode running stats, deterministic & non-trivial
    bn1 = {
        "gamma": 1.0 + 0.1 * jax.random.normal(keys[3], (H,), dtype=jnp.float32),
        "beta": 0.1 * jax.random.normal(keys[4], (H,), dtype=jnp.float32),
        "running_mean": 0.1 * jax.random.normal(keys[5], (H,), dtype=jnp.float32),
        "running_var": jnp.abs(jax.random.normal(keys[6], (H,), dtype=jnp.float32)) + 0.5,
    }
    bn2 = {
        "gamma": 1.0 + 0.1 * jax.random.normal(keys[7], (H,), dtype=jnp.float32),
        "beta": 0.1 * jax.random.normal(keys[8], (H,), dtype=jnp.float32),
        "running_mean": jnp.zeros((H,), dtype=jnp.float32),
        "running_var": jnp.ones((H,), dtype=jnp.float32),
    }

    ref = reference(x, w1, w2, bn1, bn2)

    # One-time parameter prep (hoisted out of the per-call hot path).
    params_f32 = prepare_residual_block_params(w1, w2, bn1, bn2, use_bf16=False)
    params_bf16 = prepare_residual_block_params(w1, w2, bn1, bn2, use_bf16=True)

    # f32 weights, resident-weight kernel: tight tolerance.
    out = jax.block_until_ready(residual_block_apply(x, params_f32))
    assert out.shape == (B, H) and out.dtype == jnp.float32
    assert jnp.allclose(out, ref, atol=1e-4, rtol=1e-4)

    # bf16 weights (default fast path on all generations); x / residual stay f32.
    out_bf16 = jax.block_until_ready(residual_block_apply(x, params_bf16))
    assert out_bf16.shape == (B, H) and out_bf16.dtype == jnp.float32
    assert jnp.allclose(out_bf16, ref, atol=5e-2, rtol=5e-2)

    # K-tiled fallback path (used for large Hp on v7x) — exercised here for coverage.
    out_kt = jax.block_until_ready(
        residual_block_apply(x, params_f32, force_ktiled=True))
    assert out_kt.shape == (B, H) and out_kt.dtype == jnp.float32
    assert jnp.allclose(out_kt, ref, atol=1e-4, rtol=1e-4)

    # TODO(synk): training-mode BatchNorm1d (batch statistics) and dropout p>0
    # are not modeled; kernel implements the eval-mode / p=0 forward pass.
    print("KERNEL_OK")
</pallas_src>

<mosaic_0001>
module attributes {stable_mosaic.version = 11 : i64} {
  func.func @_resident_kernel(%arg0: i32, %arg1: memref<8x128xf32, #tpu.memory_space<vmem>>, %arg2: memref<128x128xf32, #tpu.memory_space<vmem>>, %arg3: memref<128x128xf32, #tpu.memory_space<vmem>>, %arg4: memref<1x128xf32, #tpu.memory_space<vmem>>, %arg5: memref<1x128xf32, #tpu.memory_space<vmem>>, %arg6: memref<8x128xf32, #tpu.memory_space<vmem>>) attributes {dimension_semantics = [#tpu.dimension_semantics<parallel>], iteration_bounds = array<i64: 1>, scalar_prefetch = 0 : i64, scratch_operands = 0 : i64, tpu.core_type = #tpu.core_type<tc>, window_params = [{transform_indices = @transform_0, window_bounds = array<i64: 8, 128>}, {pipeline_mode = #tpu.pipeline_mode<synchronous>, transform_indices = @transform_1, window_bounds = array<i64: 128, 128>}, {pipeline_mode = #tpu.pipeline_mode<synchronous>, transform_indices = @transform_2, window_bounds = array<i64: 128, 128>}, {pipeline_mode = #tpu.pipeline_mode<synchronous>, transform_indices = @transform_3, window_bounds = array<i64: 1, 128>}, {pipeline_mode = #tpu.pipeline_mode<synchronous>, transform_indices = @transform_4, window_bounds = array<i64: 1, 128>}, {transform_indices = @transform_5, window_bounds = array<i64: 8, 128>}]} {
    %c0 = arith.constant 0 : index
    %c0_0 = arith.constant 0 : index
    %0 = vector.load %arg1[%c0, %c0_0] : memref<8x128xf32, #tpu.memory_space<vmem>>, vector<8x128xf32>
    %c0_1 = arith.constant 0 : index
    %c0_2 = arith.constant 0 : index
    %1 = vector.load %arg2[%c0_1, %c0_2] : memref<128x128xf32, #tpu.memory_space<vmem>>, vector<128x128xf32>
    %cst = arith.constant dense<0.000000e+00> : vector<8x128xf32>
    %2 = tpu.matmul %0, %1, %cst {dimension_numbers = #tpu.dot_dimension_numbers<[1], [0], [0], [1], [0, 0, 1, 1], [], []>} : vector<8x128xf32>, vector<128x128xf32>, vector<8x128xf32> -> vector<8x128xf32>
    %c0_3 = arith.constant 0 : index
    %c0_4 = arith.constant 0 : index
    %3 = vector.load %arg4[%c0_3, %c0_4] : memref<1x128xf32, #tpu.memory_space<vmem>>, vector<1x128xf32>
    %4 = vector.broadcast %3 : vector<1x128xf32> to vector<8x128xf32>
    %5 = arith.addf %2, %4 : vector<8x128xf32>
    %cst_5 = arith.constant 0.000000e+00 : f32
    %6 = vector.broadcast %cst_5 : f32 to vector<8x128xf32>
    %7 = arith.maximumf %5, %6 : vector<8x128xf32>
    %c0_6 = arith.constant 0 : index
    %c0_7 = arith.constant 0 : index
    %8 = vector.load %arg3[%c0_6, %c0_7] : memref<128x128xf32, #tpu.memory_space<vmem>>, vector<128x128xf32>
    %cst_8 = arith.constant dense<0.000000e+00> : vector<8x128xf32>
    %9 = tpu.matmul %7, %8, %cst_8 {dimension_numbers = #tpu.dot_dimension_numbers<[1], [0], [0], [1], [0, 0, 1, 1], [], []>} : vector<8x128xf32>, vector<128x128xf32>, vector<8x128xf32> -> vector<8x128xf32>
    %c0_9 = arith.constant 0 : index
    %c0_10 = arith.constant 0 : index
    %10 = vector.load %arg5[%c0_9, %c0_10] : memref<1x128xf32, #tpu.memory_space<vmem>>, vector<1x128xf32>
    %11 = vector.broadcast %10 : vector<1x128xf32> to vector<8x128xf32>
    %12 = arith.addf %9, %11 : vector<8x128xf32>
    %cst_11 = arith.constant 0.000000e+00 : f32
    %13 = vector.broadcast %cst_11 : f32 to vector<8x128xf32>
    %14 = arith.maximumf %12, %13 : vector<8x128xf32>
    %15 = arith.addf %14, %0 : vector<8x128xf32>
    %c0_12 = arith.constant 0 : index
    %c0_13 = arith.constant 0 : index
    %16 = vector.load %arg6[%c0_12, %c0_13] : memref<8x128xf32, #tpu.memory_space<vmem>>, vector<8x128xf32>
    tpu.vector_store %arg6[%c0_12, %c0_13], %15 {strides = array<i32>} : memref<8x128xf32, #tpu.memory_space<vmem>>, vector<8x128xf32>,
    return
  }
  func.func @transform_0(%arg0: i32) -> (i32, i32) {
    %c0_i32 = arith.constant 0 : i32
    %c0_i32_0 = arith.constant 0 : i32
    return %arg0, %c0_i32 : i32, i32
  }
  func.func @transform_1(%arg0: i32) -> (i32, i32) {
    %c0_i32 = arith.constant 0 : i32
    %c0_i32_0 = arith.constant 0 : i32
    %c0_i32_1 = arith.constant 0 : i32
    return %c0_i32, %c0_i32_0 : i32, i32
  }
  func.func @transform_2(%arg0: i32) -> (i32, i32) {
    %c0_i32 = arith.constant 0 : i32
    %c0_i32_0 = arith.constant 0 : i32
    %c0_i32_1 = arith.constant 0 : i32
    return %c0_i32, %c0_i32_0 : i32, i32
  }
  func.func @transform_3(%arg0: i32) -> (i32, i32) {
    %c0_i32 = arith.constant 0 : i32
    %c0_i32_0 = arith.constant 0 : i32
    %c0_i32_1 = arith.constant 0 : i32
    return %c0_i32, %c0_i32_0 : i32, i32
  }
  func.func @transform_4(%arg0: i32) -> (i32, i32) {
    %c0_i32 = arith.constant 0 : i32
    %c0_i32_0 = arith.constant 0 : i32
    %c0_i32_1 = arith.constant 0 : i32
    return %c0_i32, %c0_i32_0 : i32, i32
  }
  func.func @transform_5(%arg0: i32) -> (i32, i32) {
    %c0_i32 = arith.constant 0 : i32
    %c0_i32_0 = arith.constant 0 : i32
    return %arg0, %c0_i32 : i32, i32
  }
}

</mosaic_0001>

<bundles_post_ra>
// kernel: tpu_custom_call.1
= control target key start
LH: loop header
LB: loop body
LE: loop exit
PB: predicated region body
PF: predicated region fallthrough
CT: control target
= control target key end

     0   :  { %10 = vsyncpa [#allocation3], 0  ;;  %s333_s0 = inlined_call_operand.hbm [shape: f32[8,128], index: 0, kind: input, shape index: {}]   ;;  %s334_s1 = inlined_call_operand.hbm [shape: f32[128,128], index: 1, kind: input, shape index: {}]   ;;  %s335_s2 = inlined_call_operand.hbm [shape: f32[128,128], index: 2, kind: input, shape index: {}]   ;;  %s336_s3 = inlined_call_operand.vmem [shape: f32[1,128], index: 3, kind: input, shape index: {}]   ;;  %s337_s4 = inlined_call_operand.vmem [shape: f32[1,128], index: 4, kind: input, shape index: {}]   ;;  %s338_s5 = inlined_call_operand.hbm [shape: f32[8,128], index: 5, kind: output, shape index: {}]  }
   0x1   :  { %11 = vsyncpa [#allocation6], 0  ;;  %s28_s20 = sshll.u32 %s334_s1, 4  ;;  %s29_s20 = int_to_ptr.hbm [resolvable:$true] %s28_s20 }
   0x2   :  { %12 = vsyncpa [#allocation4], 0  ;;  %s279_s21 = smov [#allocation5]   ;;  %s18_s25 = sshll.u32 %s333_s0, 4  ;;  %s19_s25 = int_to_ptr.hbm [resolvable:$true] %s18_s25 }
   0x3   :  { %s30_s22 = sshll.u32 %s279_s21, 4  ;;  %s280_s26 = smov 128   ;;  %s31_s22 = int_to_ptr.vmem [resolvable:$true] %s30_s22 }
   0x4   :  { %s281_s27 = smov 8   ;;  %s282_s28 = smov [#allocation2]  }
   0x5   :  { %36 = dma.hbm_to_vmem [thread:$0]  %s29_s20, 2048, %s31_s22, [#allocation6], %s280_s26, %s280_s26, %s281_s27  }
   0x6   :  { %s20_s29 = sshll.u32 %s282_s28, 4  ;;  %s41_s7 = sshll.u32 %s335_s2, 4  ;;  %s21_s29 = int_to_ptr.vmem [resolvable:$true] %s20_s29  ;;  %s42_s7 = int_to_ptr.hbm [resolvable:$true] %s41_s7 }
   0x7   :  { %23 = dma.hbm_to_vmem [thread:$0]  %s19_s25, 128, %s21_s29, [#allocation3]  }
   0x8   :  { %s283_s1 = smov [#allocation7]  }
   0x9   :  { %s43_s8 = sshll.u32 %s283_s1, 4  ;;  %s44_s8 = int_to_ptr.vmem [resolvable:$true] %s43_s8 }
   0xa   :  { %49 = dma.hbm_to_vmem [thread:$0]  %s42_s7, 2048, %s44_s8, [#allocation6], %s280_s26, %s280_s26, %s281_s27  }
   0xb   :  { %273 = dma.done.wait [#allocation3], 128  }
   0xc   :  { %274 = vsyncadd [#allocation3], 4294967168 }
   0xd   :  { %275 = dma.done.wait [#allocation6], 4096  }
   0xe   :  { %276 = vsyncadd [#allocation6], 4294963200  ;;  %v82_v0 = vld [vmem:[#allocation5 + $0x78] sm:$0xff]  ;;  %v81_v1 = vld [vmem:[#allocation5 + $0x70] sm:$0xff]  ;;  %s284_s11 = smov [#allocation8]   ;;  %s158_s15 = sshll.u32 %s338_s5, 4  ;;  %s159_s15 = int_to_ptr.hbm [resolvable:$true] %s158_s15 }
   0xf   :  { %87 = vmatpush.msra.mxu0 %v82_v0  ;;  %v80_v2 = vld [vmem:[#allocation5 + $0x68] sm:$0xff]  ;;  %v79_v3 = vld [vmem:[#allocation5 + $0x60] sm:$0xff]  ;;  %v123_v4 = vld [vmem:[#allocation7 + $0x78] sm:$0xff]  ;;  %s156_s12 = sshll.u32 %s284_s11, 4  ;;  %s157_s12 = int_to_ptr.vmem [resolvable:$true] %s156_s12 }
  0x10   :  { %v78_v5 = vld [vmem:[#allocation5 + $0x58] sm:$0xff]  ;;  %128 = vmatpush.msra.mxu1 %v123_v4  ;;  %v122_v6 = vld [vmem:[#allocation7 + $0x70] sm:$0xff]  ;;  %v121_v7 = vld [vmem:[#allocation7 + $0x68] sm:$0xff] }
  0x11   :  { %88 = vmatpush.msra.mxu0 %v81_v1  ;;  %v77_v8 = vld [vmem:[#allocation5 + $0x50] sm:$0xff]  ;;  %v120_v9 = vld [vmem:[#allocation7 + $0x60] sm:$0xff]  ;;  %v76_v10 = vld [vmem:[#allocation5 + $0x48] sm:$0xff] }
  0x12   :  { %129 = vmatpush.msra.mxu1 %v122_v6  ;;  %v119_v11 = vld [vmem:[#allocation7 + $0x58] sm:$0xff]  ;;  %v75_v12 = vld [vmem:[#allocation5 + $0x40] sm:$0xff]  ;;  %v118_v13 = vld [vmem:[#allocation7 + $0x50] sm:$0xff] }
  0x13   :  { %89 = vmatpush.msra.mxu0 %v80_v2  ;;  %v74_v14 = vld [vmem:[#allocation5 + $0x38] sm:$0xff]  ;;  %v117_v15 = vld [vmem:[#allocation7 + $0x48] sm:$0xff]  ;;  %v73_v16 = vld [vmem:[#allocation5 + $0x30] sm:$0xff] }
  0x14   :  { %130 = vmatpush.msra.mxu1 %v121_v7  ;;  %v116_v17 = vld [vmem:[#allocation7 + $0x40] sm:$0xff]  ;;  %v72_v18 = vld [vmem:[#allocation5 + $0x28] sm:$0xff]  ;;  %v115_v19 = vld [vmem:[#allocation7 + $0x38] sm:$0xff] }
  0x15   :  { %90 = vmatpush.msra.mxu0 %v79_v3  ;;  %v71_v20 = vld [vmem:[#allocation5 + $0x20] sm:$0xff]  ;;  %v114_v21 = vld [vmem:[#allocation7 + $0x30] sm:$0xff]  ;;  %v70_v22 = vld [vmem:[#allocation5 + $0x18] sm:$0xff] }
  0x16   :  { %131 = vmatpush.msra.mxu1 %v120_v9  ;;  %v113_v23 = vld [vmem:[#allocation7 + $0x28] sm:$0xff]  ;;  %v69_v24 = vld [vmem:[#allocation5 + $0x10] sm:$0xff]  ;;  %v112_v25 = vld [vmem:[#allocation7 + $0x20] sm:$0xff] }
  0x17   :  { %91 = vmatpush.msra.mxu0 %v78_v5  ;;  %v68_v26 = vld [vmem:[#allocation5 + $0x8] sm:$0xff]  ;;  %v111_v27 = vld [vmem:[#allocation7 + $0x18] sm:$0xff]  ;;  %v67_v28 = vld [vmem:[#allocation5] sm:$0xff] }
  0x18   :  { %132 = vmatpush.msra.mxu1 %v119_v11  ;;  %v66_v29 = vld [vmem:[#allocation2] sm:$0xff]  ;;  %v110_v30 = vld [vmem:[#allocation7 + $0x10] sm:$0xff]  ;;  %v109_v31 = vld [vmem:[#allocation7 + $0x8] sm:$0xff] }
  0x19   :  { %92 = vmatpush.msra.mxu0 %v77_v8  ;;  %v108_v32 = vld [vmem:[#allocation7] sm:$0xff]  ;;  %v175_v33 = vld [vmem:[%s336_s3] ss:$0 sm:$0xff] }
  0x1a   :  { %133 = vmatpush.msra.mxu1 %v118_v13  ;;  %v176_v37 = vld [vmem:[%s337_s4] ss:$0 sm:$0xff] }
  0x1b   :  { %93 = vmatpush.msra.mxu0 %v76_v10 }
  0x1c   :  { %134 = vmatpush.msra.mxu1 %v117_v15 }
  0x1d   :  { %94 = vmatpush.msra.mxu0 %v75_v12 }
  0x1e   :  { %135 = vmatpush.msra.mxu1 %v116_v17 }
  0x1f   :  { %95 = vmatpush.msra.mxu0 %v74_v14 }
  0x20   :  { %136 = vmatpush.msra.mxu1 %v115_v19 }
  0x21   :  { %96 = vmatpush.msra.mxu0 %v73_v16 }
  0x22   :  { %137 = vmatpush.msra.mxu1 %v114_v21 }
  0x23   :  { %97 = vmatpush.msra.mxu0 %v72_v18 }
  0x24   :  { %138 = vmatpush.msra.mxu1 %v113_v23 }
  0x25   :  { %98 = vmatpush.msra.mxu0 %v71_v20 }
  0x26   :  { %139 = vmatpush.msra.mxu1 %v112_v25 }
  0x27   :  { %99 = vmatpush.msra.mxu0 %v70_v22 }
  0x28   :  { %140 = vmatpush.msra.mxu1 %v111_v27 }
  0x29   :  { %100 = vmatpush.msra.mxu0 %v69_v24 }
  0x2a   :  { %141 = vmatpush.msra.mxu1 %v110_v30 }
  0x2b   :  { %101 = vmatpush.msra.mxu0 %v68_v26 }
  0x2c   :  { %142 = vmatpush.msra.mxu1 %v109_v31 }
  0x2d   :  { %102 = vmatpush.msra.mxu0 %v67_v28 }
  0x2e   :  { %103 = vmatmul.f32.vlgmr.msra.gmra.mxu0 %v66_v29  ;;  %143 = vmatpush.msra.mxu1 %v108_v32 }
  0xab   :  { %v104_v34 = vpop.f32.mrf.mxu0 }
  0xac   :  { %v105_v35 = vadd.f32 %v175_v33, %v104_v34 }
  0xae   :  { %v107_v36 = vmax.f32 %v105_v35, 0.0 }
  0xb0   :  { %144 = vmatmul.f32.vlgmr.msra.gmra.mxu1 %v107_v36 }
 0x12d   :  { %v145_v38 = vpop.f32.mrf.mxu1 }
 0x12e   :  { %v146_v39 = vadd.f32 %v176_v37, %v145_v38 }
 0x130   :  { %v148_v40 = vmax.f32 %v146_v39, 0.0 }
 0x132   :  { %v149_v41 = vadd.f32 %v148_v40, %v66_v29 }
 0x134   :  { %150 = vst [vmem:[#allocation8] sm:$0xff] %v149_v41 }
 0x135   :  { %161 = dma.vmem_to_hbm [thread:$0]  %s157_s12, 128, %s159_s15, [#allocation4]  }
 0x136   :  { %277 = dma.done.wait [#allocation4], 128  }
 0x137   :  { %278 = vsyncadd [#allocation4], 4294967168 }
 0x138   :  { %166 = vsyncpa [#allocation3], 1 }
 0x139   :  { %167 = vsyncpa [#allocation6], 1 }
 0x13a   :  { %168 = vsyncpa [#allocation4], 1 }

</bundles_post_ra>
